<compile_context>
chip_gen: v7x
topology: tpu7x:2x2x1
jax: 0.10.0
libtpu: 0.0.40
codegen_flags: <defaults>
</compile_context>

<pallas_src>
import functools

import jax
import jax.numpy as jnp
from jax.experimental import pallas as pl
from jax.experimental.pallas import tpu as pltpu

# Deterministic stand-ins for interpreter.get_input_details()/get_output_details()
# quantization metadata (there is no checkpoint / .tflite file to read).
INV_IN_SCALE = 255.0       # 1 / input quantization scale (scale = 1/255)
IN_ZERO_POINT = 0.0
OUT_SCALE = 0.00787402
OUT_ZERO_POINT = 3.0
INT8 = True                # corresponds to `input['dtype'] == np.uint8`

_DEFAULT_VMEM_CAP = 64 * 1024 * 1024   # v7x worst case (per TensorCore)


@functools.lru_cache(maxsize=None)
def _vmem_limit_bytes():
    """Scoped VMEM limit derived from the actual chip (safe on v5e/v6e/v7x)."""
    cap = _DEFAULT_VMEM_CAP
    try:
        info = pltpu.get_tpu_info()
        cap = int(getattr(info, "vmem_capacity_bytes", cap))
    except Exception:
        pass
    return min(cap // 2, 48 * 1024 * 1024)


def _tile_byte_budget():
    """Double-buffered per-block byte budget (all streams), with headroom."""
    return (_vmem_limit_bytes() * 3) // 4


def _compiler_params():
    return pltpu.CompilerParams(
        dimension_semantics=("parallel", "parallel"),
        vmem_limit_bytes=_vmem_limit_bytes(),
    )


def _tile_rows(total, row_bytes, batch, align=32, min_blocks=2):
    """Largest row tile (multiple of `align`, or the full dim) whose
    double-buffered footprint fits the VMEM budget.  When batch == 1 the axis
    is split into >= min_blocks blocks so both v7x TensorCores get work."""
    budget = _tile_byte_budget()
    max_rows = max(align, (budget // (2 * row_bytes)) // align * align)
    tr = min(total, max_rows)
    if batch == 1 and total > align * min_blocks:
        per = -(-total // min_blocks)              # ceil(total / min_blocks)
        per = -(-per // align) * align             # round up to alignment
        tr = min(tr, per)
    if tr >= total:
        return total                               # full dim: no alignment needed
    return max(align, (tr // align) * align)


def _quantize_kernel(im_ref, q_ref):
    # im_ref: (1, TR, W) float32 rows of the flattened NCHW image
    # q_ref : (1, TR, W) uint8   quantized values, clamped to [0, 255]
    q = im_ref[...] * INV_IN_SCALE            # multiply, not divide (VALU not EUP)
    if IN_ZERO_POINT != 0.0:                  # trace-time constant fold
        q = q + IN_ZERO_POINT
    q = jnp.clip(q, 0.0, 255.0)
    # i32 staging kept: guaranteed Mosaic lowering for the u8 store; one extra
    # VPU pack op is free in this DMA-bound kernel.
    q_ref[...] = q.astype(jnp.int32).astype(jnp.uint8)


def _postprocess_kernel(yq_ref, scale_ref, bias_ref, o_ref):
    # yq_ref   : (1, TN, NO) uint8   -- raw quantized detections (native layout)
    # scale_ref: (1, 1, NO)  float32 -- OUT_SCALE * [w, h, w, h, 1, ...]
    # bias_ref : (1, 1, NO)  float32 -- -OUT_ZERO_POINT * scale
    # o_ref    : (1, TN, NO) float32
    y = yq_ref[...].astype(jnp.float32)
    o_ref[...] = y * scale_ref[...] + bias_ref[...]


def quantize_image(im_nchw):
    """(im / scale + zero_point).astype(uint8), lane-dense over W, NCHW layout."""
    b, ch, h, w = im_nchw.shape
    rows = ch * h
    tr = _tile_rows(rows, row_bytes=w * (4 + 1), batch=b, align=32, min_blocks=2)
    im_flat = im_nchw.reshape(b, rows, w)
    q_flat = pl.pallas_call(
        _quantize_kernel,
        out_shape=jax.ShapeDtypeStruct((b, rows, w), jnp.uint8),
        grid=(b, pl.cdiv(rows, tr)),
        in_specs=[pl.BlockSpec((1, tr, w), lambda i, j: (i, j, 0))],
        out_specs=pl.BlockSpec((1, tr, w), lambda i, j: (i, j, 0)),
        compiler_params=_compiler_params(),
    )(im_flat)
    # Keep the device result in NCHW layout.  The NHWC interleave that feeds
    # interpreter.set_tensor is a host-side step (a minor-dim-3 relayout on TPU
    # is lane-sparse and costs more than the quantize kernel itself).
    return q_flat.reshape(b, ch, h, w)


def postprocess_detections(y_quant, w, h):
    """Dequantize + box scale, fused affine, native (B, N, NO) layout (no transposes)."""
    b, n, no = y_quant.shape
    tn = _tile_rows(n, row_bytes=no * (1 + 4), batch=b, align=32, min_blocks=4)
    box = jnp.concatenate(
        [jnp.array([w, h, w, h], jnp.float32), jnp.ones((no - 4,), jnp.float32)]
    )
    scale_row = (OUT_SCALE * box).reshape(1, 1, no)          # scale' = scale * box
    bias_row = (-OUT_ZERO_POINT) * scale_row                 # bias'  = -zp * scale'
    return pl.pallas_call(
        _postprocess_kernel,
        out_shape=jax.ShapeDtypeStruct((b, n, no), jnp.float32),
        grid=(b, pl.cdiv(n, tn)),
        in_specs=[
            pl.BlockSpec((1, tn, no), lambda i, j: (i, j, 0)),
            pl.BlockSpec((1, 1, no), lambda i, j: (0, 0, 0)),
            pl.BlockSpec((1, 1, no), lambda i, j: (0, 0, 0)),
        ],
        out_specs=pl.BlockSpec((1, tn, no), lambda i, j: (i, j, 0)),
        compiler_params=_compiler_params(),
    )(y_quant, scale_row, bias_row)


def detect_multibackend_forward(im, y_quant, val=False):
    """Pallas port of DetectMultiBackend.forward.

    im      : (B, C, H, W) float32  -- NCHW input, as in the PyTorch module
    y_quant : (B, N, NO)   uint8    -- stand-in for the TFLite interpreter's raw
                                       quantized output tensor

    Returns (module_output, im_quantized).  im_quantized is the uint8 tensor
    (NCHW layout; host does the NHWC interleave for interpreter.set_tensor); it
    is returned so the quantize path is observable (not dead-code-eliminated).
    """
    b, ch, h, w = im.shape

    # self.fp16 is False by default -> no half() cast.
    if INT8:
        im_q = quantize_image(im)          # NCHW uint8
    else:
        im_q = im

    # TODO(synk): interpreter.set_tensor / interpreter.invoke / get_tensor (the
    # TFLite model graph itself) has no Pallas equivalent; `y_quant` stands in
    # for the interpreter's raw quantized output tensor.

    y = postprocess_detections(y_quant, w, h)

    out = (y, []) if val else y
    return out, im_q


if __name__ == "__main__":
    key = jax.random.PRNGKey(0)
    k_im, k_y = jax.random.split(key)

    # Small shapes consistent with the forward: NCHW image, (B, anchors, 4+1+nc) detections.
    B, C, H, W = 2, 3, 16, 16
    N, NO = 24, 16  # 24 anchors, 4 box + 1 obj + 11 classes

    im = jax.random.uniform(k_im, (B, C, H, W), dtype=jnp.float32)  # values in [0, 1)
    y_quant = jax.random.randint(k_y, (B, N, NO), 0, 256, dtype=jnp.int32).astype(jnp.uint8)

    y, im_q = detect_multibackend_forward(im, y_quant)
    jax.block_until_ready((y, im_q))

    # Pure-JAX reference for the quantize path (same convention: mul, clip, truncate).
    q_ref = jnp.clip(im * INV_IN_SCALE + IN_ZERO_POINT, 0.0, 255.0)
    q_ref = q_ref.astype(jnp.int32).astype(jnp.uint8)
    assert im_q.shape == (B, C, H, W) and im_q.dtype == jnp.uint8
    assert int(jnp.max(jnp.abs(im_q.astype(jnp.int32) - q_ref.astype(jnp.int32)))) <= 1

    # Pure-JAX reference for the postprocess path.
    y_ref = (y_quant.astype(jnp.float32) - OUT_ZERO_POINT) * OUT_SCALE
    scale_vec = jnp.concatenate(
        [jnp.array([W, H, W, H], jnp.float32), jnp.ones((NO - 4,), jnp.float32)]
    )
    y_ref = y_ref * scale_vec
    assert y.shape == (B, N, NO) and y.dtype == jnp.float32
    assert jnp.allclose(y, y_ref, rtol=1e-5, atol=1e-5)

    print("KERNEL_OK")
</pallas_src>

<mosaic_0001>
module attributes {stable_mosaic.version = 11 : i64} {
  func.func @_quantize_kernel(%arg0: i32, %arg1: i32, %arg2: memref<1x48x16xf32, #tpu.memory_space<vmem>>, %arg3: memref<1x48x16xi8, #tpu.memory_space<vmem>>) attributes {dimension_semantics = [#tpu.dimension_semantics<parallel>, #tpu.dimension_semantics<parallel>], iteration_bounds = array<i64: 2, 1>, scalar_prefetch = 0 : i64, scratch_operands = 0 : i64, tpu.core_type = #tpu.core_type<tc>, window_params = [{transform_indices = @transform_0, window_bounds = array<i64: 1, 48, 16>}, {transform_indices = @transform_1, window_bounds = array<i64: 1, 48, 16>}]} {
    %c0 = arith.constant 0 : index
    %c0_0 = arith.constant 0 : index
    %c0_1 = arith.constant 0 : index
    %0 = vector.load %arg2[%c0, %c0_0, %c0_1] : memref<1x48x16xf32, #tpu.memory_space<vmem>>, vector<1x48x16xf32>
    %cst = arith.constant 2.550000e+02 : f32
    %1 = vector.broadcast %cst : f32 to vector<1x48x16xf32>
    %2 = arith.mulf %0, %1 : vector<1x48x16xf32>
    %cst_2 = arith.constant 0.000000e+00 : f32
    %cst_3 = arith.constant 2.550000e+02 : f32
    %3 = vector.broadcast %cst_2 : f32 to vector<1x48x16xf32>
    %4 = arith.maximumf %3, %2 : vector<1x48x16xf32>
    %5 = vector.broadcast %cst_3 : f32 to vector<1x48x16xf32>
    %6 = arith.minimumf %5, %4 : vector<1x48x16xf32>
    %7 = arith.fptosi %6 : vector<1x48x16xf32> to vector<1x48x16xi32>
    %8 = arith.trunci %7 : vector<1x48x16xi32> to vector<1x48x16xi8>
    %c0_4 = arith.constant 0 : index
    %c0_5 = arith.constant 0 : index
    %c0_6 = arith.constant 0 : index
    %9 = vector.load %arg3[%c0_4, %c0_5, %c0_6] : memref<1x48x16xi8, #tpu.memory_space<vmem>>, vector<1x48x16xi8>
    tpu.vector_store %arg3[%c0_4, %c0_5, %c0_6], %8 {strides = array<i32>} : memref<1x48x16xi8, #tpu.memory_space<vmem>>, vector<1x48x16xi8>,
    return
  }
  func.func @transform_0(%arg0: i32, %arg1: i32) -> (i32, i32, i32) {
    %c0_i32 = arith.constant 0 : i32
    %c0_i32_0 = arith.constant 0 : i32
    return %arg0, %arg1, %c0_i32 : i32, i32, i32
  }
  func.func @transform_1(%arg0: i32, %arg1: i32) -> (i32, i32, i32) {
    %c0_i32 = arith.constant 0 : i32
    %c0_i32_0 = arith.constant 0 : i32
    return %arg0, %arg1, %c0_i32 : i32, i32, i32
  }
}

</mosaic_0001>

<bundles_post_ra>
// kernel: tpu_custom_call.1
= control target key start
LH: loop header
LB: loop body
LE: loop exit
PB: predicated region body
PF: predicated region fallthrough
CT: control target
= control target key end

     0   :  { %s373_s6 = smov 0   ;;  %s375_s7 = smov 0   ;;  %s410_s0 = inlined_call_operand.vmem [shape: f32[2,48,16], index: 0, kind: input, shape index: {}]   ;;  %s411_s1 = inlined_call_operand.vmem [shape: u8[2,48,16], index: 1, kind: output, shape index: {}]  }
   0x1   :  { %s377_s8 = smov 0  }
   0x2 LB: > { %s23_s9 = sadd.s32 1, %s357_s7  ;;  %p296_p0 = scmp.ge.s32.totalorder %s361_s8, 1  ;;  %s361_s8 = sphi %s377_s8, %s11_s8   ;;  %s357_s7 = sphi %s375_s7, %s413_s7   ;;  %s353_s6 = sphi %s373_s6, %s412_s6  }
   0x3   : > { %p25_p1 = scmp.ge.s32.totalorder %s23_s9, 2  ;;  %p108_p2 = scmp.lt.s32.totalorder %s361_s8, 3 }
   0x5   : > { %s415_s9 = smov (%p25_p1, %s23_s9), 0  ;;  %p109_p3 = pnand %p296_p0, %p108_p2 }
   0x6   : > { %p137_p4 = scmp.lt.s32.totalorder (!%p109_p3), %s353_s6, 1  ;;  %vm198_vm0 = vcmask (!%p109_p3), 123904  }
   0x7   : > { %112 = sbr.rel (%p109_p3) target bundleno = 36 (0x24), region = 24 }
   0xe   : > { %s417_s6 = smov (!%p137_p4, %s353_s6), 1 }
   0xf   : > { %s301_s10 = smul.u32 48, %s417_s6 }
  0x10   : > { %s302_s14 = smul.u32 12, %s417_s6 }
  0x11   : > { %s144_s13 = scalar_lea.vmem %s410_s0, %s301_s10 }
  0x12   : > { %v156_v0 = vld [vmem:[%s144_s13] sm:$0xff]  ;;  %v157_v1 = vld [vmem:[%s144_s13 + $0x8] sm:$0xff]  ;;  %v158_v2 = vld [vmem:[%s144_s13 + $0x10] sm:$0xff]  ;;  %s154_s17 = scalar_lea.vmem %s411_s1, %s302_s14 }
  0x13   : > { %v162_v3 = vmul.f32 255.0, %v156_v0  ;;  %v163_v4 = vmul.f32 255.0, %v157_v1  ;;  %v164_v5 = vmul.f32 255.0, %v158_v2  ;;  %v159_v6 = vld [vmem:[%s144_s13 + $0x18] sm:$0xff]  ;;  %v160_v7 = vld [vmem:[%s144_s13 + $0x20] sm:$0xff]  ;;  %v161_v8 = vld [vmem:[%s144_s13 + $0x28] sm:$0xff] }
  0x14   : > { %v165_v9 = vmul.f32 255.0, %v159_v6  ;;  %v166_v10 = vmul.f32 255.0, %v160_v7  ;;  %v167_v11 = vmul.f32 255.0, %v161_v8 }
  0x15   : > { %v168_v12 = vmax.f32 %v162_v3, 0.0  ;;  %v169_v13 = vmax.f32 %v163_v4, 0.0  ;;  %v170_v14 = vmax.f32 %v164_v5, 0.0 }
  0x16   : > { %v171_v15 = vmax.f32 %v165_v9, 0.0  ;;  %v172_v16 = vmax.f32 %v166_v10, 0.0  ;;  %v173_v17 = vmax.f32 %v167_v11, 0.0 }
  0x17   : > { %v174_v18 = vmin.f32 %v168_v12, 255.0  ;;  %v175_v19 = vmin.f32 %v169_v13, 255.0  ;;  %v176_v20 = vmin.f32 %v170_v14, 255.0 }
  0x18   : > { %v177_v21 = vmin.f32 %v171_v15, 255.0  ;;  %v178_v22 = vmin.f32 %v172_v16, 255.0  ;;  %v179_v23 = vmin.f32 %v173_v17, 255.0 }
  0x19   : > { %v303_v24 = vtrunc.f32 %v174_v18  ;;  %v305_v25 = vtrunc.f32 %v175_v19  ;;  %v307_v26 = vtrunc.f32 %v176_v20 }
  0x1a   : > { %v309_v27 = vtrunc.f32 %v177_v21  ;;  %v311_v28 = vtrunc.f32 %v178_v22  ;;  %v313_v29 = vtrunc.f32 %v179_v23 }
  0x1b   : > { %v304_v30 = vcvt.f32.s32 %v303_v24  ;;  %v306_v31 = vcvt.f32.s32 %v305_v25  ;;  %v308_v32 = vcvt.f32.s32 %v307_v26 }
  0x1c   : > { %v310_v33 = vcvt.f32.s32 %v309_v27  ;;  %v312_v34 = vcvt.f32.s32 %v311_v28  ;;  %v314_v35 = vcvt.f32.s32 %v313_v29 }
  0x1d   : > { %v186_v36 = vpack.c.b16 %v304_v30, %v304_v30  ;;  %v188_v37 = vpack.c.b16 %v306_v31, %v306_v31  ;;  %v190_v38 = vpack.c.b16 %v308_v32, %v308_v32 }
  0x1e   : > { %v192_v39 = vpack.c.b16 %v310_v33, %v310_v33  ;;  %v194_v40 = vpack.c.b16 %v312_v34, %v312_v34  ;;  %v196_v41 = vpack.c.b16 %v314_v35, %v314_v35 }
  0x1f   : > { %v187_v42 = vpack.c.b8 %v186_v36, %v186_v36  ;;  %v189_v43 = vpack.c.b8 %v188_v37, %v188_v37  ;;  %v191_v44 = vpack.c.b8 %v190_v38, %v190_v38 }
  0x20   : > { %v193_v45 = vpack.c.b8 %v192_v39, %v192_v39  ;;  %v195_v46 = vpack.c.b8 %v194_v40, %v194_v40  ;;  %v197_v47 = vpack.c.b8 %v196_v41, %v196_v41 }
  0x21   : > { %199 = vst.msk [vmem:[%s154_s17] sm:$0x3] %vm198_vm0, %v187_v42  ;;  %200 = vst.msk [vmem:[%s154_s17 + $0x2] sm:$0x3] %vm198_vm0, %v189_v43 }
  0x22   : > { %201 = vst.msk [vmem:[%s154_s17 + $0x4] sm:$0x3] %vm198_vm0, %v191_v44  ;;  %202 = vst.msk [vmem:[%s154_s17 + $0x6] sm:$0x3] %vm198_vm0, %v193_v45 }
  0x23   : > { %203 = vst.msk [vmem:[%s154_s17 + $0x8] sm:$0x3] %vm198_vm0, %v195_v46  ;;  %204 = vst.msk [vmem:[%s154_s17 + $0xa] sm:$0x3] %vm198_vm0, %v197_v47 }
  0x24 PF: > { %s11_s8 = sadd.s32 1, %s361_s8   ;;  %s412_s6 = smov %s357_s7 }
  0x25   : > { %p8_p5 = scmp.ge.s32.totalorder %s11_s8, 4   ;;  %s413_s7 = smov %s415_s9 }
  0x27   :  { %10 = sbr.rel (!%p8_p5) target bundleno = 2 (0x2), region = 54 }

</bundles_post_ra>
